<compile_context>
chip_gen: v7x
topology: tpu7x:2x2x1
jax: 0.10.0
libtpu: 0.0.40
codegen_flags: <defaults>
</compile_context>

<pallas_src>
import functools

import jax
import jax.numpy as jnp
from jax.experimental import pallas as pl
from jax.experimental.pallas import tpu as pltpu


def _gateconv_kernel(patch_ref, w_ref, params_ref, gmat_ref, o_ref,
                     *, cout, inv_denom, eps):
    # patch_ref : (B, KKCp, HW)   bf16 im2col patches, HW on the lane axis
    # w_ref     : (2*Cout, KKCp)  bf16 fused conv weights ('out' rows then 'gate' rows)
    # params_ref: (2, 2*Cout, 1)  f32  [0] = conv bias, [1] = [gamma; beta]
    # gmat_ref  : (Cout, Cout)    f32  0/1 group-membership matrix
    # o_ref     : (B, Cout, HW)
    w = w_ref[...]
    bias = params_ref[0]                       # (2*Cout, 1)
    gb = params_ref[1]                         # (2*Cout, 1): gamma rows then beta rows
    gamma = gb[:cout]                          # (Cout, 1)
    beta = gb[cout:]                           # (Cout, 1)
    gmat = gmat_ref[...]

    batch = patch_ref.shape[0]
    for b in range(batch):                     # static; B is tiny
        p = patch_ref[b]                       # (KKCp, HW) bf16

        # Fused conv: one lane-dense MXU matmul, f32 accumulation, f32 bias add.
        conv = jnp.dot(w, p, preferred_element_type=jnp.float32) + bias   # (2*Cout, HW)
        out = conv[:cout]                      # row split at a sublane-tile boundary
        gate = conv[cout:]

        # GroupNorm: lane-reduce HW first (exact f32), then a trivial
        # (Cout,Cout)@(Cout,1) group-sum that also broadcasts back per channel.
        ch_sum = jnp.sum(out, axis=1, keepdims=True)                      # (Cout, 1)
        mean = jnp.dot(gmat, ch_sum, preferred_element_type=jnp.float32) * inv_denom
        centered = out - mean
        ch_sq = jnp.sum(centered * centered, axis=1, keepdims=True)       # (Cout, 1)
        var = jnp.dot(gmat, ch_sq, preferred_element_type=jnp.float32) * inv_denom

        scale = gamma * jax.lax.rsqrt(var + eps)                          # (Cout, 1)
        aff = centered * scale + beta                                     # (Cout, HW)

        # SiLU(norm) * sigmoid(gate); single unmasked lane-dense store.
        o_ref[b] = (aff * jax.nn.sigmoid(aff) * jax.nn.sigmoid(gate)).astype(o_ref.dtype)


def gate_conv_forward(x_nchw, conv_w, conv_b, gn_gamma, gn_beta,
                      *, groups, stride=1, padding=1, eps=1e-6,
                      out_dtype=jnp.float32, samples_per_block=None):
    """Forward pass of GateConv. Returns NCHW output (N, Cout, Hout, Wout)."""
    N, Cin, H, W = x_nchw.shape
    Cout2, _, KH, KW = conv_w.shape
    cout = Cout2 // 2
    cpg = cout // groups

    Hout = (H + 2 * padding - KH) // stride + 1
    Wout = (W + 2 * padding - KW) // stride + 1
    HW = Hout * Wout
    KKC = KH * KW * Cin
    KKCp = ((KKC + 7) // 8) * 8            # pad contraction dim to a sublane multiple

    if samples_per_block is None:
        # Keep >= 2 parallel grid steps (v7x has 2 TensorCores) and batch the
        # remaining samples per step (amortizes per-step cost on v5e/v6e).
        target_steps = 2 if N >= 2 else 1
        b = max(1, N // target_steps)
        while N % b:
            b -= 1
        samples_per_block = b
    B = samples_per_block
    assert N % B == 0
    num_steps = N // B

    # ---- glue: im2col in NCHW, channel-major, HW flattened on the last axis ----
    x = x_nchw.astype(jnp.float32)
    xp = jnp.pad(x, ((0, 0), (0, 0), (padding, padding), (padding, padding)))
    pieces = []
    for kh in range(KH):
        for kw in range(KW):
            pieces.append(xp[:, :,
                             kh:kh + (Hout - 1) * stride + 1:stride,
                             kw:kw + (Wout - 1) * stride + 1:stride])
    # concat along channel axis -> index = (kh*KW + kw)*Cin + ci
    patches = jnp.concatenate(pieces, axis=1).reshape(N, KKC, HW)      # (N, KKC, HW)
    if KKCp != KKC:
        patches = jnp.pad(patches, ((0, 0), (0, KKCp - KKC), (0, 0)))
    patches = patches.astype(jnp.bfloat16)     # bf16 MXU operand / halved HBM stream

    # Fused weights: w_t[co, (kh*KW+kw)*Cin + ci] = conv_w[co, ci, kh, kw]
    w_t = jnp.transpose(conv_w, (0, 2, 3, 1)).reshape(Cout2, KKC)
    if KKCp != KKC:
        w_t = jnp.pad(w_t, ((0, 0), (0, KKCp - KKC)))
    w_t = w_t.astype(jnp.bfloat16)

    # Pack all per-channel params into one input: [0] = conv bias, [1] = [gamma; beta].
    params = jnp.stack([
        conv_b.astype(jnp.float32).reshape(Cout2, 1),
        jnp.concatenate([gn_gamma, gn_beta]).astype(jnp.float32).reshape(Cout2, 1),
    ], axis=0)                                                          # (2, 2*Cout, 1)

    gidx = jnp.arange(cout) // cpg
    gmat = (gidx[:, None] == gidx[None, :]).astype(jnp.float32)        # (Cout, Cout)

    kernel = functools.partial(_gateconv_kernel, cout=cout,
                               inv_denom=1.0 / float(HW * cpg), eps=eps)

    patch_spec_kwargs = {}
    if num_steps >= 3:
        # Deeper pipelining on the streamed operand once there are enough steps.
        patch_spec_kwargs["pipeline_mode"] = pl.Buffered(3)

    out = pl.pallas_call(
        kernel,
        out_shape=jax.ShapeDtypeStruct((N, cout, HW), out_dtype),
        grid_spec=pltpu.PrefetchScalarGridSpec(
            num_scalar_prefetch=0,
            grid=(num_steps,),
            in_specs=[
                pl.BlockSpec((B, KKCp, HW), lambda n: (n, 0, 0),
                             **patch_spec_kwargs),
                pl.BlockSpec((Cout2, KKCp), lambda n: (0, 0)),
                pl.BlockSpec((2, Cout2, 1), lambda n: (0, 0, 0)),
                pl.BlockSpec((cout, cout), lambda n: (0, 0)),
            ],
            out_specs=pl.BlockSpec((B, cout, HW), lambda n: (n, 0, 0)),
        ),
        compiler_params=pltpu.CompilerParams(
            dimension_semantics=("parallel",)),
    )(patches, w_t, params, gmat)

    return out.reshape(N, cout, Hout, Wout)                            # NCHW


def _reference(x_nchw, conv_w, conv_b, gn_gamma, gn_beta, *, groups, eps=1e-6):
    """Plain-JAX reference matching PyTorch semantics (NCHW)."""
    conv = jax.lax.conv_general_dilated(
        x_nchw, conv_w, window_strides=(1, 1), padding=((1, 1), (1, 1)),
        dimension_numbers=("NCHW", "OIHW", "NCHW"))
    conv = conv + conv_b[None, :, None, None]
    cout = conv.shape[1] // 2
    out, gate = conv[:, :cout], conv[:, cout:]

    N, C, H, W = out.shape
    og = out.reshape(N, groups, C // groups, H, W)
    mean = og.mean(axis=(2, 3, 4), keepdims=True)
    var = ((og - mean) ** 2).mean(axis=(2, 3, 4), keepdims=True)
    norm = ((og - mean) * jax.lax.rsqrt(var + eps)).reshape(N, C, H, W)
    norm = norm * gn_gamma[None, :, None, None] + gn_beta[None, :, None, None]
    return jax.nn.silu(norm) * jax.nn.sigmoid(gate)


if __name__ == "__main__":
    # Module config: GateConv(in_channels=4, out_channels=8, group_size=2,
    #                         kernel_size=3, stride=1, padding=1), GroupNorm eps=1e-6.
    N, Cin, H, W = 2, 4, 16, 16
    Cout, groups, K = 8, 2, 3

    key = jax.random.PRNGKey(0)
    k1, k2, k3, k4, k5 = jax.random.split(key, 5)

    x = jax.random.normal(k1, (N, Cin, H, W), dtype=jnp.float32)
    conv_w = jax.random.normal(k2, (2 * Cout, Cin, K, K), dtype=jnp.float32) * 0.1
    conv_b = jax.random.normal(k3, (2 * Cout,), dtype=jnp.float32) * 0.1
    gn_gamma = 1.0 + 0.1 * jax.random.normal(k4, (Cout,), dtype=jnp.float32)
    gn_beta = 0.1 * jax.random.normal(k5, (Cout,), dtype=jnp.float32)

    y_nchw = gate_conv_forward(x, conv_w, conv_b, gn_gamma, gn_beta,
                               groups=groups, stride=1, padding=1, eps=1e-6)
    y_nchw = jax.block_until_ready(y_nchw)

    # Primary check: reference fed with bf16-rounded x / conv_w, matching the
    # kernel's bf16 MXU operands (both sides accumulate in f32).
    x_r = x.astype(jnp.bfloat16).astype(jnp.float32)
    w_r = conv_w.astype(jnp.bfloat16).astype(jnp.float32)
    ref_b = _reference(x_r, w_r, conv_b, gn_gamma, gn_beta, groups=groups, eps=1e-6)
    # Sanity check against the exact-f32 reference (only bf16 input rounding differs).
    ref_f = _reference(x, conv_w, conv_b, gn_gamma, gn_beta, groups=groups, eps=1e-6)

    assert y_nchw.shape == ref_f.shape == (N, Cout, H, W)
    assert jnp.max(jnp.abs(y_nchw - ref_b)) < 2e-3
    assert jnp.max(jnp.abs(y_nchw - ref_f)) < 5e-2

    print("KERNEL_OK")
</pallas_src>

<mosaic_0001>
module attributes {stable_mosaic.version = 11 : i64} {
  func.func @_gateconv_kernel(%arg0: i32, %arg1: memref<1x40x256xbf16, #tpu.memory_space<vmem>>, %arg2: memref<16x40xbf16, #tpu.memory_space<vmem>>, %arg3: memref<2x16x1xf32, #tpu.memory_space<vmem>>, %arg4: memref<8x8xf32, #tpu.memory_space<vmem>>, %arg5: memref<1x8x256xf32, #tpu.memory_space<vmem>>) attributes {dimension_semantics = [#tpu.dimension_semantics<parallel>], iteration_bounds = array<i64: 2>, scalar_prefetch = 0 : i64, scratch_operands = 0 : i64, tpu.core_type = #tpu.core_type<tc>, window_params = [{transform_indices = @transform_0, window_bounds = array<i64: 1, 40, 256>}, {pipeline_mode = #tpu.pipeline_mode<synchronous>, transform_indices = @transform_1, window_bounds = array<i64: 16, 40>}, {pipeline_mode = #tpu.pipeline_mode<synchronous>, transform_indices = @transform_2, window_bounds = array<i64: 2, 16, 1>}, {pipeline_mode = #tpu.pipeline_mode<synchronous>, transform_indices = @transform_3, window_bounds = array<i64: 8, 8>}, {transform_indices = @transform_4, window_bounds = array<i64: 1, 8, 256>}]} {
    %c0 = arith.constant 0 : index
    %c0_0 = arith.constant 0 : index
    %0 = vector.load %arg2[%c0, %c0_0] : memref<16x40xbf16, #tpu.memory_space<vmem>>, vector<16x40xbf16>
    %c0_1 = arith.constant 0 : index
    %c0_2 = arith.constant 0 : index
    %c0_3 = arith.constant 0 : index
    %1 = vector.load %arg3[%c0_1, %c0_2, %c0_3] : memref<2x16x1xf32, #tpu.memory_space<vmem>>, vector<1x16x1xf32>
    %2 = vector.shape_cast %1 : vector<1x16x1xf32> to vector<16x1xf32>
    %c1 = arith.constant 1 : index
    %c0_4 = arith.constant 0 : index
    %c0_5 = arith.constant 0 : index
    %3 = vector.load %arg3[%c1, %c0_4, %c0_5] : memref<2x16x1xf32, #tpu.memory_space<vmem>>, vector<1x16x1xf32>
    %4 = vector.shape_cast %3 : vector<1x16x1xf32> to vector<16x1xf32>
    %5 = vector.extract_strided_slice %4 {offsets = [0, 0], sizes = [8, 1], strides = [1, 1]} : vector<16x1xf32> to vector<8x1xf32>
    %6 = vector.extract_strided_slice %4 {offsets = [8, 0], sizes = [8, 1], strides = [1, 1]} : vector<16x1xf32> to vector<8x1xf32>
    %c0_6 = arith.constant 0 : index
    %c0_7 = arith.constant 0 : index
    %7 = vector.load %arg4[%c0_6, %c0_7] : memref<8x8xf32, #tpu.memory_space<vmem>>, vector<8x8xf32>
    %c0_8 = arith.constant 0 : index
    %c0_9 = arith.constant 0 : index
    %c0_10 = arith.constant 0 : index
    %8 = vector.load %arg1[%c0_8, %c0_9, %c0_10] : memref<1x40x256xbf16, #tpu.memory_space<vmem>>, vector<1x40x256xbf16>
    %9 = vector.shape_cast %8 : vector<1x40x256xbf16> to vector<40x256xbf16>
    %cst = arith.constant dense<0.000000e+00> : vector<16x256xf32>
    %10 = tpu.matmul %0, %9, %cst {dimension_numbers = #tpu.dot_dimension_numbers<[1], [0], [0], [1], [0, 0, 1, 1], [], []>} : vector<16x40xbf16>, vector<40x256xbf16>, vector<16x256xf32> -> vector<16x256xf32>
    %11 = vector.broadcast %2 : vector<16x1xf32> to vector<16x256xf32>
    %12 = arith.addf %10, %11 : vector<16x256xf32>
    %13 = vector.extract_strided_slice %12 {offsets = [0, 0], sizes = [8, 256], strides = [1, 1]} : vector<16x256xf32> to vector<8x256xf32>
    %14 = vector.extract_strided_slice %12 {offsets = [8, 0], sizes = [8, 256], strides = [1, 1]} : vector<16x256xf32> to vector<8x256xf32>
    %cst_11 = arith.constant dense<0.000000e+00> : vector<8xf32>
    %15 = vector.multi_reduction <add>, %13, %cst_11 [1] : vector<8x256xf32> to vector<8xf32>
    %16 = vector.shape_cast %15 : vector<8xf32> to vector<8x1xf32>
    %cst_12 = arith.constant dense<0.000000e+00> : vector<8x1xf32>
    %17 = tpu.matmul %7, %16, %cst_12 {dimension_numbers = #tpu.dot_dimension_numbers<[1], [0], [0], [1], [0, 0, 1, 1], [], []>} : vector<8x8xf32>, vector<8x1xf32>, vector<8x1xf32> -> vector<8x1xf32>
    %cst_13 = arith.constant 9.765625E-4 : f32
    %18 = vector.broadcast %cst_13 : f32 to vector<8x1xf32>
    %19 = arith.mulf %17, %18 : vector<8x1xf32>
    %20 = vector.broadcast %19 : vector<8x1xf32> to vector<8x256xf32>
    %21 = arith.subf %13, %20 : vector<8x256xf32>
    %22 = arith.mulf %21, %21 : vector<8x256xf32>
    %cst_14 = arith.constant dense<0.000000e+00> : vector<8xf32>
    %23 = vector.multi_reduction <add>, %22, %cst_14 [1] : vector<8x256xf32> to vector<8xf32>
    %24 = vector.shape_cast %23 : vector<8xf32> to vector<8x1xf32>
    %cst_15 = arith.constant dense<0.000000e+00> : vector<8x1xf32>
    %25 = tpu.matmul %7, %24, %cst_15 {dimension_numbers = #tpu.dot_dimension_numbers<[1], [0], [0], [1], [0, 0, 1, 1], [], []>} : vector<8x8xf32>, vector<8x1xf32>, vector<8x1xf32> -> vector<8x1xf32>
    %cst_16 = arith.constant 9.765625E-4 : f32
    %26 = vector.broadcast %cst_16 : f32 to vector<8x1xf32>
    %27 = arith.mulf %25, %26 : vector<8x1xf32>
    %cst_17 = arith.constant 9.99999997E-7 : f32
    %28 = vector.broadcast %cst_17 : f32 to vector<8x1xf32>
    %29 = arith.addf %27, %28 : vector<8x1xf32>
    %30 = math.rsqrt %29 : vector<8x1xf32>
    %31 = arith.mulf %5, %30 : vector<8x1xf32>
    %32 = vector.broadcast %31 : vector<8x1xf32> to vector<8x256xf32>
    %33 = arith.mulf %21, %32 : vector<8x256xf32>
    %34 = vector.broadcast %6 : vector<8x1xf32> to vector<8x256xf32>
    %35 = arith.addf %33, %34 : vector<8x256xf32>
    %36 = arith.negf %35 : vector<8x256xf32>
    %37 = math.exp %36 : vector<8x256xf32>
    %cst_18 = arith.constant 1.000000e+00 : f32
    %38 = vector.broadcast %cst_18 : f32 to vector<8x256xf32>
    %39 = arith.addf %38, %37 : vector<8x256xf32>
    %40 = arith.divf %38, %39 : vector<8x256xf32>
    %41 = arith.mulf %35, %40 : vector<8x256xf32>
    %42 = arith.negf %14 : vector<8x256xf32>
    %43 = math.exp %42 : vector<8x256xf32>
    %cst_19 = arith.constant 1.000000e+00 : f32
    %44 = vector.broadcast %cst_19 : f32 to vector<8x256xf32>
    %45 = arith.addf %44, %43 : vector<8x256xf32>
    %46 = arith.divf %44, %45 : vector<8x256xf32>
    %47 = arith.mulf %41, %46 : vector<8x256xf32>
    %c0_20 = arith.constant 0 : index
    %c0_21 = arith.constant 0 : index
    %c0_22 = arith.constant 0 : index
    %48 = vector.load %arg5[%c0_20, %c0_21, %c0_22] : memref<1x8x256xf32, #tpu.memory_space<vmem>>, vector<1x8x256xf32>
    %49 = vector.shape_cast %48 : vector<1x8x256xf32> to vector<8x256xf32>
    %50 = vector.shape_cast %47 : vector<8x256xf32> to vector<1x8x256xf32>
    tpu.vector_store %arg5[%c0_20, %c0_21, %c0_22], %50 {strides = array<i32>} : memref<1x8x256xf32, #tpu.memory_space<vmem>>, vector<1x8x256xf32>,
    return
  }
  func.func @transform_0(%arg0: i32) -> (i32, i32, i32) {
    %c0_i32 = arith.constant 0 : i32
    %c0_i32_0 = arith.constant 0 : i32
    %c0_i32_1 = arith.constant 0 : i32
    return %arg0, %c0_i32, %c0_i32_0 : i32, i32, i32
  }
  func.func @transform_1(%arg0: i32) -> (i32, i32) {
    %c0_i32 = arith.constant 0 : i32
    %c0_i32_0 = arith.constant 0 : i32
    %c0_i32_1 = arith.constant 0 : i32
    return %c0_i32, %c0_i32_0 : i32, i32
  }
  func.func @transform_2(%arg0: i32) -> (i32, i32, i32) {
    %c0_i32 = arith.constant 0 : i32
    %c0_i32_0 = arith.constant 0 : i32
    %c0_i32_1 = arith.constant 0 : i32
    %c0_i32_2 = arith.constant 0 : i32
    return %c0_i32, %c0_i32_0, %c0_i32_1 : i32, i32, i32
  }
  func.func @transform_3(%arg0: i32) -> (i32, i32) {
    %c0_i32 = arith.constant 0 : i32
    %c0_i32_0 = arith.constant 0 : i32
    %c0_i32_1 = arith.constant 0 : i32
    return %c0_i32, %c0_i32_0 : i32, i32
  }
  func.func @transform_4(%arg0: i32) -> (i32, i32, i32) {
    %c0_i32 = arith.constant 0 : i32
    %c0_i32_0 = arith.constant 0 : i32
    %c0_i32_1 = arith.constant 0 : i32
    return %arg0, %c0_i32, %c0_i32_0 : i32, i32, i32
  }
}

</mosaic_0001>

<bundles_post_ra>
// kernel: tpu_custom_call.1
= control target key start
LH: loop header
LB: loop body
LE: loop exit
PB: predicated region body
PF: predicated region fallthrough
CT: control target
= control target key end

     0   :  { %9 = vsyncpa [#allocation3], 0  ;;  %s1048_s0 = inlined_call_operand.hbm [shape: bf16[2,40,256], index: 0, kind: input, shape index: {}]   ;;  %s1049_s1 = inlined_call_operand.vmem [shape: bf16[16,40], index: 1, kind: input, shape index: {}]   ;;  %s1050_s2 = inlined_call_operand.vmem [shape: f32[2,16,1], index: 2, kind: input, shape index: {}]   ;;  %s1051_s3 = inlined_call_operand.vmem [shape: f32[8,8], index: 3, kind: input, shape index: {}]   ;;  %s1052_s4 = inlined_call_operand.hbm [shape: f32[2,8,256], index: 4, kind: output, shape index: {}]  }
   0x1   :  { %11 = vsyncpa [#allocation3 + $0x1], 0 }
   0x2   :  { %12 = vsyncpa [#allocation4], 0 }
   0x3   :  { %14 = vsyncpa [#allocation4 + $0x1], 0  ;;  %s873_s15 = smov 0   ;;  %s875_s16 = smov 0  }
   0x4   :  { %s877_s17 = smov 0   ;;  %s879_s18 = smov 0  }
   0x5 LB: > { %s894_s19 = sadd.s32 4294967295, %s839_s18   ;;  %s617_s20 = sadd.s32 4294967294, %s839_s18   ;;  %s839_s18 = sphi %s879_s18, %s1064_s18   ;;  %s835_s17 = sphi %s877_s17, %s1063_s17   ;;  %s831_s16 = sphi %s875_s16, %s1062_s16   ;;  %s827_s15 = sphi %s873_s15, %s1061_s15  }
   0x6   : > { %s898_s21 = sadd.s32 1, %s839_s18   ;;  %s27_s22 = sadd.s32 1, %s835_s17 }
   0x7   : > { %s24_s23 = ssub.s32 %s839_s18, %s898_s21  ;;  %p34_p0 = scmp.ne.s32.totalorder %s835_s17, %s831_s16 }
   0x8   : > { %p25_p1 = scmp.eq.s32.totalorder %s24_s23, 0  ;;  %p35_p2 = scmp.eq.s32.totalorder %s839_s18, 0 }
   0x9   : > { %p40_p3 = scmp.ne.s32.totalorder %s831_s16, %s827_s15  ;;  %p41_p4 = scmp.eq.s32.totalorder %s894_s19, 0 }
   0xa   : > { %s910_s24 = scalar_select %p25_p1, %s835_s17, %s27_s22  }
   0xb   : > { %p36_p5 = por %p35_p2, %p34_p0  ;;  %p912_p6 = por %p41_p4, %p40_p3 }
   0xc   : > { %p127_p7 = scmp.eq.s32.totalorder %s894_s19, 1  ;;  %p133_p8 = scmp.eq.s32.totalorder %s617_s20, 1 }
   0xd   : > { %p675_p10 = scmp.lt.s32.totalorder %s839_s18, 2  ;;  %s162_s28 = sand.u32 1, %s835_s17  }
   0xe   : > { %p919_p11 = por %p127_p7, %p34_p0  ;;  %p923_p12 = por %p133_p8, %p40_p3 }
   0xf   : > { %s661_s29 = smul.u32 640, %s839_s18  ;;  %p934_p13 = pnand %p675_p10, %p36_p5 }
  0x10   : > { %s1055_s26 = scalar_select %p919_p11, 1, 0 }
  0x11   : > { %s1056_s27 = scalar_select %p923_p12, 1, 0 }
  0x12   : > { %s660_s30 = smul.u32 40, %s162_s28  ;;  %s932_s7 = scalar_lea.hbm %s1048_s0, %s661_s29 }
  0x13   : > { %s940_s11 = scalar_lea.sflag [#allocation3], %s162_s28  ;;  %s743_s12 = scalar_lea.hbm %s932_s7, 640 }
  0x14   : > { %s166_s9 = scalar_lea.vmem [#allocation2], %s660_s30  ;;  %p744_p0 = scmp.ne.s32.totalorder %s932_s7, %s743_s12 }
  0x15   : > { %s173_s10 = sshll.u32 %s166_s9, 4  ;;  %p745_p1 = pneg %p934_p13  ;;  %s938_s10 = int_to_ptr.vmem [resolvable:$true] %s173_s10 }
  0x16   : > { %s748_s20 = scalar_lea.hbm %s1048_s0, 1280  ;;  %p749_p4 = scmp.lt.u32.totalorder %s932_s7, %s1048_s0 }
  0x17   : > { %p746_p2 = pnand %p745_p1, %p744_p0  ;;  %p750_p5 = scmp.lt.u32.totalorder %s748_s20, %s743_s12 }
  0x18   : > { %p752_p8 = scmp.lt.u32.totalorder %s743_s12, %s932_s7 }
  0x19   : > { %p747_p3 = pneg %p746_p2  ;;  %p751_p7 = por %p750_p5, %p749_p4 }
  0x1b   : > { %p753_p10 = por %p752_p8, %p751_p7 }
  0x1d   : > { %p754_p9 = pnand %p753_p10, %p747_p3 }
  0x1f   : > { %757 = shalt.err (!%p754_p9)
}
  0x20   : > { %s758_s28 = scalar_lea.vmem %s938_s10, 640  ;;  %s841_s29 = smov [#allocation2]  }
  0x21   : > { %p759_p0 = scmp.ne.s32.totalorder %s938_s10, %s758_s28  ;;  %s763_s30 = sshll.u32 %s841_s29, 4  ;;  %s764_s30 = int_to_ptr.vmem [resolvable:$false] %s763_s30 }
  0x22   : > { %s765_s5 = scalar_lea.vmem %s764_s30, 1280  ;;  %p766_p11 = scmp.lt.s32.totalorder %s938_s10, %s764_s30 }
  0x23   : > { %p761_p2 = pnand %p759_p0, %p745_p1  ;;  %p767_p4 = scmp.lt.s32.totalorder %s765_s5, %s758_s28 }
  0x25   : > { %p762_p12 = pneg %p761_p2  ;;  %p768_p5 = por %p767_p4, %p766_p11 }
  0x27   : > { %p769_p7 = pnand %p768_p5, %p762_p12 }
  0x29   : > { %772 = shalt.err (!%p769_p7)
}
  0x2a   : > { %s842_s6 = smov 128   ;;  %s843_s9 = smov 8  }
  0x2b   : > { %670 = dma.hbm_to_vmem [thread:$0]  (!%p934_p13), %s932_s7, 640, %s938_s10, %s940_s11, %s842_s6, %s842_s6, %s843_s9  }
  0x2c   : > { %p621_p9 = scmp.ge.s32.totalorder %s839_s18, 1  ;;  %p181_p1 = scmp.lt.s32.totalorder %s839_s18, 3 }
  0x2e   : > { %p182_p3 = pnand %p621_p9, %p181_p1 }
  0x2f   : > { %s971_s12 = sand.u32 (!%p182_p3), 1, %s831_s16  }
  0x30   : > { %185 = sbr.rel (%p182_p3) target bundleno = 1327 (0x52f), region = 36  ;;  %s188_s14 = scalar_lea.sflag (!%p182_p3), [#allocation3], %s971_s12 }
  0x31   : > { %s662_s13 = smul.u32 (!%p182_p3), 40, %s971_s12 }
  0x33   : > { %s191_s20 = scalar_lea.vmem (!%p182_p3), [#allocation2], %s662_s13 }
  0x37   : > { %818 = dma.done.wait (%p912_p6), %s188_s14, 640  }
  0x38   : > { %820 = vsyncadd (%p912_p6), %s188_s14, 4294966656  ;;  %v844_v0 = vmov 0   ;;  %v716_v1 = vld [vmem:[%s191_s20 + $0x4] ss:$8 sps:$4 sm:$0xff]   ;;  %v718_v2 = vld [vmem:[%s191_s20] ss:$8 sps:$4 sm:$0xff]  }
  0x39   : > { %313 = vmatprep.mubr.bf16.mxu0 %v844_v0  ;;  %714 = vset.pattern.permute.xlu0 %v844_v0  ;;  %v719_v3 = vld [vmem:[%s191_s20 + $0x14] ss:$8 sps:$4 sm:$0xff]   ;;  %v229_v4 = vld [vmem:[%s191_s20 + $0x20] sm:$0xff]  ;;  %v721_v5 = vld [vmem:[%s191_s20 + $0x10] ss:$8 sps:$4 sm:$0xff]   ;;  %vm274_vm0 = vcmask 1043456  }
  0x3a   : > { %715 = vset.pattern.permute.xlu1 %v844_v0  ;;  %281 = vmatprep.subr.bf16.mxu0 %v716_v1  ;;  %v631_v6 = vcombine.high %v229_v4, %v229_v4  ;;  %v630_v7 = vcombine.low %v229_v4, %v229_v4  ;;  %v219_v8 = vld [vmem:[%s1050_s2] sm:$0xff]  ;;  %vm270_vm1 = vcmask 326656   ;;  %v845_v11 = vmov 0.0   ;;  %v624_v31 = vld [vmem:[%s1050_s2 + $0x18] sm:$0xff]  ;;  %v623_v37 = vld [vmem:[%s1050_s2 + $0x10] sm:$0xff]  ;;  %s622_s9 = sshll.u32 %s971_s12, 4 }
  0x3b   : > { %282 = vmatpush1.bf16.msra.mxu0 %v718_v2  ;;  %232 = vperm.xlu0 %714, %v219_v8   ;;  %v724_v10 = vld [vmem:[%s1049_s1] sm:$0xff]   ;;  %vm846_vm2 = vmmov 0   ;;  %vm327_vm3 = vcmask 64512   ;;  %v220_v40 = vld [vmem:[%s1050_s2 + $0x8] sm:$0xff]  ;;  %s645_s13 = sshll.u32 %s894_s19, 8  ;;  %s215_s14 = scalar_lea.vmem [#allocation5], %s622_s9 }
  0x3c   : > { %283 = vmatprep.subr.bf16.mxu0 %v719_v3  ;;  %v276_v9 = vsel %vm274_vm0, %v630_v7, 0  ;;  %650 = vmatprep.subr.mxu1 %v845_v11  ;;  %v224_v20 = vld [vmem:[%s1051_s3] sm:$0xff]  ;;  %s547_s20 = sshll.u32 %s215_s14, 4  ;;  %s1004_s25 = scalar_lea.hbm %s1052_s4, %s645_s13  ;;  %s1006_s20 = int_to_ptr.vmem [resolvable:$true] %s547_s20 }
  0x3d   : > { %652 = vmatprep.mubr.msk.f32.mxu1 %vm846_vm2, %v845_v11  ;;  %s533_s19 = scalar_lea.sflag [#allocation4], %s971_s12  ;;  %s773_s10 = scalar_lea.vmem %s1006_s20, 256 }
  0x3e   : > { %p774_p6 = scmp.ne.s32.totalorder %s1006_s20, %s773_s10  ;;  %p1058_p11 = scmp.ne.s32.totalorder %s1055_s26, 0 }
  0x3f   : > { %284 = vmatpush1.bf16.msra.mxu0 %v721_v5  ;;  %s847_s11 = smov [#allocation5]  }
  0x40   : > { %632 = vmatprep.subr.msk.bf16.mxu0 %vm274_vm0, %v631_v6  ;;  %p775_p12 = pnand %p774_p6, %p1058_p11  ;;  %s777_s22 = sshll.u32 %s847_s11, 4  ;;  %s778_s22 = int_to_ptr.vmem [resolvable:$false] %s777_s22 }
  0x41   : > { %s779_s23 = scalar_lea.vmem %s778_s22, 512  ;;  %p780_p8 = scmp.lt.s32.totalorder %s1006_s20, %s778_s22 }
  0x42   : > { %p776_p13 = pneg %p775_p12  ;;  %p781_p10 = scmp.lt.s32.totalorder %s779_s23, %s773_s10 }
  0x43   : > { %286 = vmatpush1.bf16.msra.mxu0 %v276_v9 }
  0x44   : > { %p782_p0 = por %p781_p10, %p780_p8 }
  0x46   : > { %633 = vmatmul.mubr.msk.bf16.vlgmr.msra.gmra.mrb[0].mxu0 %vm270_vm1, %v724_v10  ;;  %p783_p2 = pnand %p782_p0, %p776_p13 }
  0xba   : > { %v233_v12 = vpop.permute.xlu0 %232 }
 0x119   : > { %v315_v13 = vpop.f32.mrb[0].mxu0 }
 0x11a   : > { %v316_v14 = vadd.f32 %v315_v13, %v233_v12  ;;  %v317_v15 = vpop.f32.mrb[1].mxu0 }
 0x11b   : > { %v318_v16 = vadd.f32 %v317_v15, %v233_v12  ;;  %v319_v17 = vpop.f32.mrb[2].mxu0 }
 0x11c   : > { %v321_v18 = vpop.f32.mrb[3].mxu0 }
 0x11d   : > { %v324_v19 = vadd.f32 %v318_v16, %v316_v14 }
 0x11f   : > { %325 = vadd.xlane.f32.xlu0 %v324_v19 }
 0x1ac   : > { %v326_v21 = vpop.xlane.xlu0 %325 }
 0x1ad   : > { %651 = vmatpush3.msra.mxu1 %v326_v21 }
 0x1ae   : > { %653 = vmatmul.mubr.msk.f32.vlgmr.msra.gmra.mrb[0].mxu1 %vm327_vm3, %v224_v20  ;;  %655 = vmatprep.subr.mxu1 %v845_v11 }
 0x1af   : > { %657 = vmatprep.mubr.msk.f32.mxu1 %vm846_vm2, %v845_v11 }
 0x281   : > { %v397_v22 = vpop.f32.mrb[0].mxu1 }
 0x282   : > { %v401_v23 = vmul.f32 0.0009765625, %v397_v22  ;;  %v654_v24 = vpop.f32.mrb[1].mxu1 }
 0x284   : > { %404 = vperm.xlu1 %715, %v401_v23  }
 0x303   : > { %v405_v25 = vpop.permute.xlu1 %404 }
 0x304   : > { %v407_v26 = vsub.f32 %v316_v14, %v405_v25  ;;  %v408_v27 = vsub.f32 %v318_v16, %v405_v25 }
 0x306   : > { %v409_v28 = vmul.f32 %v407_v26, %v407_v26  ;;  %v410_v29 = vmul.f32 %v408_v27, %v408_v27 }
 0x308   : > { %v411_v30 = vadd.f32 %v410_v29, %v409_v28 }
 0x30a   : > { %412 = vadd.xlane.f32.xlu1 %v411_v30 }
 0x31b   : > { %497 = vperm.xlu1 %715, %v624_v31  }
 0x397   : > { %v413_v32 = vpop.xlane.xlu1 %412 }
 0x398   : > { %656 = vmatpush3.msra.mxu1 %v413_v32 }
 0x399   : > { %658 = vmatmul.mubr.msk.f32.vlgmr.msra.gmra.mrb[2].mxu1 %vm327_vm3, %v224_v20 }
 0x39b   : > { %v498_v44 = vpop.permute.xlu1 %497 }
 0x46c   : > { %v480_v33 = vpop.f32.mrb[2].mxu1 }
 0x46d   : > { %v484_v34 = vmul.f32 0.0009765625, %v480_v33  ;;  %v659_v35 = vpop.f32.mrb[3].mxu1 }
 0x46f   : > { %v485_v36 = vadd.f32 1e-06, %v484_v34 }
 0x471   : > { %725 = vrsqrt.f32 %v485_v36 }
 0x47b   : > { %v726_v38 = vpop.eup %725 }
 0x47c   : > { %v487_v39 = vmul.f32 %v726_v38, %v623_v37 }
 0x47e   : > { %490 = vperm.xlu0 %714, %v487_v39  }
 0x482   : > { %237 = vperm.xlu0 %714, %v220_v40  }
 0x4fd   : > { %v491_v41 = vpop.permute.xlu0 %490 }
 0x4fe   : > { %v493_v42 = vmul.f32 %v491_v41, %v407_v26  ;;  %v494_v43 = vmul.f32 %v491_v41, %v408_v27 }
 0x500   : > { %v500_v45 = vadd.f32 %v498_v44, %v493_v42  ;;  %v501_v46 = vadd.f32 %v498_v44, %v494_v43 }
 0x501   : > { %v238_v47 = vpop.permute.xlu0 %237 }
 0x502   : > { %v636_v48 = vmul.f32 -1.442695, %v500_v45  ;;  %v637_v49 = vmul.f32 -1.442695, %v501_v46  ;;  %v320_v50 = vadd.f32 %v319_v17, %v238_v47  ;;  %v322_v51 = vadd.f32 %v321_v18, %v238_v47 }
 0x504   : > { %727 = vpow2.f32 %v636_v48  ;;  %v638_v52 = vmul.f32 -1.442695, %v320_v50  ;;  %v639_v53 = vmul.f32 -1.442695, %v322_v51 }
 0x505   : > { %729 = vpow2.f32 %v637_v49 }
 0x506   : > { %731 = vpow2.f32 %v638_v52 }
 0x507   : > { %733 = vpow2.f32 %v639_v53 }
 0x50e   : > { %v728_v54 = vpop.eup %727 }
 0x50f   : > { %v730_v55 = vpop.eup %729  ;;  %v508_v56 = vadd.f32 1.0, %v728_v54 }
 0x510   : > { %v732_v57 = vpop.eup %731  ;;  %v509_v58 = vadd.f32 1.0, %v730_v55 }
 0x511   : > { %v734_v59 = vpop.eup %733  ;;  %735 = vrcp.f32 %v508_v56  ;;  %v522_v60 = vadd.f32 1.0, %v732_v57 }
 0x512   : > { %737 = vrcp.f32 %v509_v58  ;;  %v523_v61 = vadd.f32 1.0, %v734_v59 }
 0x513   : > { %739 = vrcp.f32 %v522_v60 }
 0x514   : > { %741 = vrcp.f32 %v523_v61 }
 0x51b   : > { %v736_v62 = vpop.eup %735 }
 0x51c   : > { %v738_v63 = vpop.eup %737  ;;  %v514_v0 = vmul.f32 %v736_v62, %v500_v45 }
 0x51d   : > { %v740_v1 = vpop.eup %739  ;;  %v515_v2 = vmul.f32 %v738_v63, %v501_v46 }
 0x51e   : > { %v742_v3 = vpop.eup %741  ;;  %v528_v4 = vmul.f32 %v740_v1, %v514_v0 }
 0x51f   : > { %v529_v5 = vmul.f32 %v742_v3, %v515_v2 }
 0x520   : > { %530 = vst [vmem:[%s215_s14] sm:$0xff] %v528_v4 }
 0x521   : > { %531 = vst [vmem:[%s215_s14 + $0x8] sm:$0xff] %v529_v5 }
 0x522   : > { %786 = shalt.err (!%p783_p2)
}
 0x523   : > { %s787_s12 = scalar_lea.hbm %s1004_s25, 256  ;;  %s791_s30 = scalar_lea.hbm %s1052_s4, 512 }
 0x524   : > { %p788_p4 = scmp.ne.s32.totalorder %s1004_s25, %s787_s12  ;;  %p792_p9 = scmp.lt.u32.totalorder %s1004_s25, %s1052_s4 }
 0x525   : > { %p793_p1 = scmp.lt.u32.totalorder %s791_s30, %s787_s12  ;;  %p795_p6 = scmp.lt.u32.totalorder %s787_s12, %s1004_s25 }
 0x526   : > { %p789_p5 = pnand %p788_p4, %p1058_p11 }
 0x527   : > { %p794_p3 = por %p793_p1, %p792_p9 }
 0x528   : > { %p790_p7 = pneg %p789_p5 }
 0x529   : > { %p796_p12 = por %p795_p6, %p794_p3 }
 0x52b   : > { %p797_p13 = pnand %p796_p12, %p790_p7 }
 0x52d   : > { %800 = shalt.err (!%p797_p13)
}
 0x52e   : > { %665 = dma.vmem_to_hbm [thread:$0]  (%p1058_p11), %s1006_s20, 256, %s1004_s25, %s533_s19  }
 0x52f PF: > { %s559_s9 = sand.u32 1, %s827_s15   ;;  %p1059_p8 = scmp.ne.s32.totalorder %s1056_s27, 0 }
 0x530   : > { %p1060_p10 = scmp.ge.s32.totalorder %s839_s18, 2  ;;  %s560_s13 = scalar_lea.sflag [#allocation4], %s559_s9 }
 0x532   : > { %p672_p0 = pnand %p1060_p10, %p1059_p8 }
 0x534   : > { %822 = dma.done.wait (!%p672_p0), %s560_s13, 256  }
 0x535   : > { %824 = vsyncadd (!%p672_p0), %s560_s13, 4294967040  ;;  %p17_p2 = scmp.ge.s32.totalorder %s898_s21, 4   ;;  %s1061_s15 = smov %s831_s16 }
 0x536   : > { %s1062_s16 = smov %s835_s17  ;;  %s1063_s17 = smov %s910_s24 }
 0x537   : > { %s1064_s18 = smov %s898_s21  ;;  %19 = sbr.rel (!%p17_p2) target bundleno = 5 (0x5), region = 82 }
 0x53e   :  { %565 = vsyncpa [#allocation3], 1 }
 0x53f   :  { %567 = vsyncpa [#allocation3 + $0x1], 1 }
 0x540   :  { %568 = vsyncpa [#allocation4], 1 }
 0x541   :  { %570 = vsyncpa [#allocation4 + $0x1], 1 }

</bundles_post_ra>
